<compile_context>
chip_gen: v5e
topology: v5e:2x2
jax: 0.10.0
libtpu: 0.0.40
codegen_flags: <defaults>
</compile_context>

<pallas_src>
import functools

import jax
import jax.numpy as jnp
from jax.experimental import pallas as pl
from jax.experimental.pallas import tpu as pltpu


def _round_up(a, b):
    return (a + b - 1) // b * b


def _sublane_multiple(dtype):
    # Sub-32-bit dtypes pack along sublanes: f32 -> 8, bf16 -> 16, int8/fp8 -> 32.
    return max(8, 32 // jnp.dtype(dtype).itemsize)


def _layer_norm_kernel(x_ref, g_ref, b_ref, o_ref, *, dim, eps):
    # x_ref: (tm, D)   g_ref/b_ref: (1, D) f32   o_ref: (tm, D)
    xs = x_ref[...].astype(jnp.float32)
    inv_d = jnp.float32(1.0 / dim)
    # Single-pass moments: var = E[x^2] - mean^2 (f32 accumulation).
    s1 = jnp.sum(xs, axis=-1, keepdims=True)
    s2 = jnp.sum(xs * xs, axis=-1, keepdims=True)
    mean = s1 * inv_d
    var = jnp.maximum(s2 * inv_d - mean * mean, jnp.float32(0.0))
    rstd = jax.lax.rsqrt(var + jnp.float32(eps))
    y = (xs - mean) * rstd * g_ref[...] + b_ref[...]
    o_ref[...] = y.astype(o_ref.dtype)


def layer_norm(x, gamma, beta, *, eps=1e-5):
    """LayerNorm over the last dim of x (any leading shape), Pallas TPU kernel."""
    orig_shape = x.shape
    D = orig_shape[-1]
    M = x.size // D
    x2 = x.reshape(M, D)

    sub = _sublane_multiple(x2.dtype)
    in_bytes = x2.dtype.itemsize
    out_bytes = x2.dtype.itemsize

    # VMEM-budget-aware row tile: ~12 MiB of double-buffered in+out per grid
    # step (fits the default/raised scoped VMEM on v5e/v6e and v7x's 64 MiB),
    # but large enough (up to 8192 rows for small D) to amortize the ~0.35 us
    # per-step pipeline overhead.
    budget_bytes = 12 * 1024 * 1024
    tm = budget_bytes // (2 * D * (in_bytes + out_bytes))
    tm = max(sub, (tm // sub) * sub)
    tm = min(tm, 8192)
    tm = min(tm, _round_up(M, sub))   # never bigger than the (rounded) problem
    grid_m = pl.cdiv(M, tm)

    g = gamma.astype(jnp.float32).reshape(1, D)
    b = beta.astype(jnp.float32).reshape(1, D)

    kernel = functools.partial(_layer_norm_kernel, dim=D, eps=eps)

    bytes_accessed = (M * D * in_bytes      # input
                      + M * D * out_bytes   # output
                      + 2 * D * 4)          # gamma / beta
    cost = pl.CostEstimate(flops=7 * M * D,
                           transcendentals=M,
                           bytes_accessed=bytes_accessed)

    out = pl.pallas_call(
        kernel,
        out_shape=jax.ShapeDtypeStruct((M, D), x.dtype),
        grid_spec=pltpu.PrefetchScalarGridSpec(
            num_scalar_prefetch=0,
            grid=(grid_m,),
            in_specs=[
                pl.BlockSpec((tm, D), lambda i: (i, 0)),
                pl.BlockSpec((1, D), lambda i: (0, 0)),
                pl.BlockSpec((1, D), lambda i: (0, 0)),
            ],
            out_specs=pl.BlockSpec((tm, D), lambda i: (i, 0)),
        ),
        compiler_params=pltpu.CompilerParams(
            dimension_semantics=("parallel",),
            vmem_limit_bytes=32 * 1024 * 1024),
        cost_estimate=cost,
    )(x2, g, b)

    return out.reshape(orig_shape)


def pre_norm(x, gamma, beta, fn, *, eps=1e-5, **kwargs):
    """PreNorm.forward: return fn(LayerNorm(x), **kwargs)."""
    # TODO(synk): `fn` is an arbitrary wrapped nn.Module in PyTorch; it is taken
    # as a plain JAX callable here. For the biggest end-to-end win, fuse this
    # LayerNorm as a prologue of fn's first matmul (avoids one HBM round-trip
    # of the normalized activations).
    return fn(layer_norm(x, gamma, beta, eps=eps), **kwargs)


def _layer_norm_reference(x, gamma, beta, eps=1e-5):
    mean = x.mean(-1, keepdims=True)
    var = ((x - mean) ** 2).mean(-1, keepdims=True)
    return (x - mean) * jax.lax.rsqrt(var + eps) * gamma + beta


if __name__ == "__main__":
    # Small shapes implied by PreNorm usage: batch=2, seq=8, hidden=32.
    B, N, D = 2, 8, 32

    key = jax.random.PRNGKey(0)
    kx, kg, kb, kw = jax.random.split(key, 4)
    x = jax.random.normal(kx, (B, N, D), dtype=jnp.float32)
    gamma = 1.0 + 0.1 * jax.random.normal(kg, (D,), dtype=jnp.float32)
    beta = 0.1 * jax.random.normal(kb, (D,), dtype=jnp.float32)
    w = jax.random.normal(kw, (D, D), dtype=jnp.float32) * 0.02

    # Stand-in for the wrapped sub-module (e.g. an attention / MLP block).
    fn = lambda y: y @ w

    out = pre_norm(x, gamma, beta, fn)
    out = jax.block_until_ready(out)

    ref = _layer_norm_reference(x, gamma, beta) @ w
    assert out.shape == (B, N, D)
    assert jnp.allclose(out, ref, atol=1e-4, rtol=1e-4), float(
        jnp.max(jnp.abs(out - ref)))

    print("KERNEL_OK")
</pallas_src>

<mosaic_0001>
module attributes {stable_mosaic.version = 11 : i64} {
  func.func @_layer_norm_kernel(%arg0: i32, %arg1: memref<16x32xf32, #tpu.memory_space<vmem>>, %arg2: memref<1x32xf32, #tpu.memory_space<vmem>>, %arg3: memref<1x32xf32, #tpu.memory_space<vmem>>, %arg4: memref<16x32xf32, #tpu.memory_space<vmem>>) attributes {dimension_semantics = [#tpu.dimension_semantics<parallel>], iteration_bounds = array<i64: 1>, scalar_prefetch = 0 : i64, scratch_operands = 0 : i64, tpu.core_type = #tpu.core_type<tc>, window_params = [{transform_indices = @transform_0, window_bounds = array<i64: 16, 32>}, {pipeline_mode = #tpu.pipeline_mode<synchronous>, transform_indices = @transform_1, window_bounds = array<i64: 1, 32>}, {pipeline_mode = #tpu.pipeline_mode<synchronous>, transform_indices = @transform_2, window_bounds = array<i64: 1, 32>}, {transform_indices = @transform_3, window_bounds = array<i64: 16, 32>}]} {
    %c0 = arith.constant 0 : index
    %c0_0 = arith.constant 0 : index
    %0 = vector.load %arg1[%c0, %c0_0] : memref<16x32xf32, #tpu.memory_space<vmem>>, vector<16x32xf32>
    %cst = arith.constant dense<0.000000e+00> : vector<16xf32>
    %1 = vector.multi_reduction <add>, %0, %cst [1] : vector<16x32xf32> to vector<16xf32>
    %2 = vector.shape_cast %1 : vector<16xf32> to vector<16x1xf32>
    %3 = arith.mulf %0, %0 : vector<16x32xf32>
    %cst_1 = arith.constant dense<0.000000e+00> : vector<16xf32>
    %4 = vector.multi_reduction <add>, %3, %cst_1 [1] : vector<16x32xf32> to vector<16xf32>
    %5 = vector.shape_cast %4 : vector<16xf32> to vector<16x1xf32>
    %cst_2 = arith.constant 3.125000e-02 : f32
    %6 = vector.broadcast %cst_2 : f32 to vector<16x1xf32>
    %7 = arith.mulf %2, %6 : vector<16x1xf32>
    %cst_3 = arith.constant 3.125000e-02 : f32
    %8 = vector.broadcast %cst_3 : f32 to vector<16x1xf32>
    %9 = arith.mulf %5, %8 : vector<16x1xf32>
    %10 = arith.mulf %7, %7 : vector<16x1xf32>
    %11 = arith.subf %9, %10 : vector<16x1xf32>
    %cst_4 = arith.constant 0.000000e+00 : f32
    %12 = vector.broadcast %cst_4 : f32 to vector<16x1xf32>
    %13 = arith.maximumf %11, %12 : vector<16x1xf32>
    %cst_5 = arith.constant 9.99999974E-6 : f32
    %14 = vector.broadcast %cst_5 : f32 to vector<16x1xf32>
    %15 = arith.addf %13, %14 : vector<16x1xf32>
    %16 = math.rsqrt %15 : vector<16x1xf32>
    %17 = vector.broadcast %7 : vector<16x1xf32> to vector<16x32xf32>
    %18 = arith.subf %0, %17 : vector<16x32xf32>
    %19 = vector.broadcast %16 : vector<16x1xf32> to vector<16x32xf32>
    %20 = arith.mulf %18, %19 : vector<16x32xf32>
    %c0_6 = arith.constant 0 : index
    %c0_7 = arith.constant 0 : index
    %21 = vector.load %arg2[%c0_6, %c0_7] : memref<1x32xf32, #tpu.memory_space<vmem>>, vector<1x32xf32>
    %22 = vector.broadcast %21 : vector<1x32xf32> to vector<16x32xf32>
    %23 = arith.mulf %20, %22 : vector<16x32xf32>
    %c0_8 = arith.constant 0 : index
    %c0_9 = arith.constant 0 : index
    %24 = vector.load %arg3[%c0_8, %c0_9] : memref<1x32xf32, #tpu.memory_space<vmem>>, vector<1x32xf32>
    %25 = vector.broadcast %24 : vector<1x32xf32> to vector<16x32xf32>
    %26 = arith.addf %23, %25 : vector<16x32xf32>
    %c0_10 = arith.constant 0 : index
    %c0_11 = arith.constant 0 : index
    %27 = vector.load %arg4[%c0_10, %c0_11] : memref<16x32xf32, #tpu.memory_space<vmem>>, vector<16x32xf32>
    tpu.vector_store %arg4[%c0_10, %c0_11], %26 {strides = array<i32>} : memref<16x32xf32, #tpu.memory_space<vmem>>, vector<16x32xf32>,
    return
  }
  func.func @transform_0(%arg0: i32) -> (i32, i32) {
    %c0_i32 = arith.constant 0 : i32
    %c0_i32_0 = arith.constant 0 : i32
    return %arg0, %c0_i32 : i32, i32
  }
  func.func @transform_1(%arg0: i32) -> (i32, i32) {
    %c0_i32 = arith.constant 0 : i32
    %c0_i32_0 = arith.constant 0 : i32
    %c0_i32_1 = arith.constant 0 : i32
    return %c0_i32, %c0_i32_0 : i32, i32
  }
  func.func @transform_2(%arg0: i32) -> (i32, i32) {
    %c0_i32 = arith.constant 0 : i32
    %c0_i32_0 = arith.constant 0 : i32
    %c0_i32_1 = arith.constant 0 : i32
    return %c0_i32, %c0_i32_0 : i32, i32
  }
  func.func @transform_3(%arg0: i32) -> (i32, i32) {
    %c0_i32 = arith.constant 0 : i32
    %c0_i32_0 = arith.constant 0 : i32
    return %arg0, %c0_i32 : i32, i32
  }
}

</mosaic_0001>

<bundles_post_ra>
// kernel: tpu_custom_call.1
= control target key start
LH: loop header
LB: loop body
LE: loop exit
PB: predicated region body
PF: predicated region fallthrough
CT: control target
= control target key end

     0   :  { %8 = vsyncpa [#allocation3], 0  ;;  %s270_s0 = inlined_call_operand.hbm [shape: f32[16,32], index: 0, kind: input, shape index: {}]   ;;  %s271_s1 = inlined_call_operand.hbm [shape: f32[1,32], index: 1, kind: input, shape index: {}]   ;;  %s272_s2 = inlined_call_operand.vmem [shape: f32[1,32], index: 2, kind: input, shape index: {}]   ;;  %s273_s3 = inlined_call_operand.hbm [shape: f32[16,32], index: 3, kind: output, shape index: {}]  }
   0x1   :  { %9 = vsyncpa [#allocation6], 0 }
   0x2   :  { %10 = vsyncpa [#allocation4], 0  ;;  %s15_s14 = sshll.u32 %s270_s0, 4  ;;  %s221_s15 = smov [#allocation2]   ;;  %s16_s14 = int_to_ptr.hbm [resolvable:$true] %s15_s14 }
   0x3   :  { %s17_s16 = sshll.u32 %s221_s15, 4  ;;  %s29_s19 = sshll.u32 %s271_s1, 4  ;;  %s18_s16 = int_to_ptr.vmem [resolvable:$true] %s17_s16  ;;  %s30_s19 = int_to_ptr.hbm [resolvable:$true] %s29_s19 }
   0x4   :  { %s222_s20 = smov 128   ;;  %s223_s21 = smov 8  }
   0x5   :  { %23 = dma.hbm_to_vmem [thread:$0]  %s16_s14, 256, %s18_s16, [#allocation3], %s222_s20, %s222_s20, %s223_s21  }
   0x6   :  { %s224_s22 = smov [#allocation5]  }
   0x7   :  { %s31_s23 = sshll.u32 %s224_s22, 4  ;;  %s32_s23 = int_to_ptr.vmem [resolvable:$true] %s31_s23 }
   0x8   :  { %34 = dma.hbm_to_vmem [thread:$0]  %s30_s19, 16, %s32_s23, [#allocation6]  }
   0x9   :  { %215 = dma.done.wait [#allocation3], 256  }
   0xa   :  { %216 = vsyncadd [#allocation3], 4294967040 }
   0xb   :  { %217 = dma.done.wait [#allocation6], 16  }
   0xc   :  { %218 = vsyncadd [#allocation6], 4294967280  ;;  %vm47_vm0 = vcmask 261120   ;;  %v45_v0 = vld [vmem:[#allocation2] sm:$0xff]  ;;  %v46_v3 = vld [vmem:[#allocation2 + $0x8] sm:$0xff]  ;;  %s225_s24 = smov [#allocation7]  }
   0xd   :  { %v48_v1 = vsel %vm47_vm0, %v45_v0, 0.0  ;;  %v54_v2 = vmul.f32 %v45_v0, %v45_v0  ;;  %v55_v5 = vmul.f32 %v46_v3, %v46_v3  ;;  %v51_v6 = vsel %vm47_vm0, %v46_v3, 0.0  ;;  %v137_v33 = vld [vmem:[#allocation5] ss:$0 sm:$0xff]  ;;  %v138_v37 = vld [vmem:[%s272_s2] ss:$0 sm:$0xff] }
   0xe   :  { %49 = vadd.xlane.f32.xlu0 %v48_v1  ;;  %s116_s25 = sshll.u32 %s225_s24, 4  ;;  %s118_s28 = sshll.u32 %s273_s3, 4  ;;  %s117_s25 = int_to_ptr.vmem [resolvable:$true] %s116_s25  ;;  %s119_s28 = int_to_ptr.hbm [resolvable:$true] %s118_s28 }
   0xf   :  { %v56_v4 = vsel %vm47_vm0, %v54_v2, 0.0  ;;  %v59_v7 = vsel %vm47_vm0, %v55_v5, 0.0 }
  0x10   :  { %57 = vadd.xlane.f32.xlu1 %v56_v4 }
  0x16   :  { %52 = vadd.xlane.f32.xlu0 %v51_v6 }
  0x18   :  { %60 = vadd.xlane.f32.xlu1 %v59_v7 }
  0x81   :  { %v50_v8 = vpop.xlane.xlu0 %49 }
  0x82   :  { %v62_v9 = vmul.f32 0.03125, %v50_v8 }
  0x83   :  { %v58_v10 = vpop.xlane.xlu1 %57 }
  0x84   :  { %v66_v11 = vmul.f32 %v62_v9, %v62_v9  ;;  %v64_v12 = vmul.f32 0.03125, %v58_v10  ;;  %v94_v31 = vsub.f32 %v45_v0, %v62_v9 }
  0x86   :  { %v68_v13 = vsub.f32 %v64_v12, %v66_v11 }
  0x88   :  { %v70_v14 = vmax.f32 %v68_v13, 0.0 }
  0x89   :  { %v53_v15 = vpop.xlane.xlu0 %52 }
  0x8a   :  { %v72_v16 = vadd.f32 1e-05, %v70_v14  ;;  %v63_v17 = vmul.f32 0.03125, %v53_v15 }
  0x8b   :  { %v61_v18 = vpop.xlane.xlu1 %60 }
  0x8c   :  { %139 = vrsqrt.f32 %v72_v16  ;;  %v67_v19 = vmul.f32 %v63_v17, %v63_v17  ;;  %v65_v20 = vmul.f32 0.03125, %v61_v18  ;;  %vm80_vm2 = vweird.f32 %v72_v16 }
  0x8d   :  { %v95_v43 = vsub.f32 %v46_v3, %v63_v17 }
  0x8e   :  { %v69_v21 = vsub.f32 %v65_v20, %v67_v19 }
  0x90   :  { %v71_v22 = vmax.f32 %v69_v21, 0.0 }
  0x92   :  { %v140_v23 = vpop.eup %139  ;;  %v73_v25 = vadd.f32 1e-05, %v71_v22 }
  0x93   :  { %v75_v24 = vmul.f32 %v140_v23, %v72_v16  ;;  %vm81_vm1 = vweird.f32 %v140_v23 }
  0x94   :  { %141 = vrsqrt.f32 %v73_v25  ;;  %vm82_vm3 = vmor %vm80_vm2, %vm81_vm1  ;;  %vm90_vm5 = vweird.f32 %v73_v25 }
  0x95   :  { %v76_v26 = vmul.f32 %v140_v23, %v75_v24 }
  0x97   :  { %v77_v27 = vmul.f32 0.5, %v76_v26 }
  0x99   :  { %v78_v28 = vsub.f32 1.5, %v77_v27 }
  0x9a   :  { %v142_v29 = vpop.eup %141 }
  0x9b   :  { %v79_v30 = vmul.f32 %v140_v23, %v78_v28  ;;  %v85_v32 = vmul.f32 %v142_v29, %v73_v25  ;;  %vm91_vm4 = vweird.f32 %v142_v29 }
  0x9c   :  { %vm92_vm6 = vmor %vm90_vm5, %vm91_vm4 }
  0x9d   :  { %v83_v34 = vsel %vm82_vm3, %v140_v23, %v79_v30  ;;  %v86_v36 = vmul.f32 %v142_v29, %v85_v32 }
  0x9e   :  { %v96_v35 = vmul.f32 %v94_v31, %v83_v34 }
  0x9f   :  { %v87_v38 = vmul.f32 0.5, %v86_v36 }
  0xa0   :  { %v102_v39 = vmul.f32 %v137_v33, %v96_v35 }
  0xa1   :  { %v88_v40 = vsub.f32 1.5, %v87_v38 }
  0xa2   :  { %v108_v41 = vadd.f32 %v138_v37, %v102_v39 }
  0xa3   :  { %v89_v42 = vmul.f32 %v142_v29, %v88_v40 }
  0xa4   :  { %110 = vst.msk [vmem:[#allocation7] sm:$0xff] %vm47_vm0, %v108_v41 }
  0xa5   :  { %v93_v44 = vsel %vm92_vm6, %v142_v29, %v89_v42 }
  0xa6   :  { %v97_v45 = vmul.f32 %v95_v43, %v93_v44 }
  0xa8   :  { %v103_v46 = vmul.f32 %v137_v33, %v97_v45 }
  0xaa   :  { %v109_v47 = vadd.f32 %v138_v37, %v103_v46 }
  0xac   :  { %111 = vst.msk [vmem:[#allocation7 + $0x8] sm:$0xff] %vm47_vm0, %v109_v47 }
  0xad   :  { %124 = dma.vmem_to_hbm [thread:$0]  %s117_s25, 256, %s119_s28, [#allocation4], %s222_s20, %s222_s20, %s223_s21  }
  0xae   :  { %219 = dma.done.wait [#allocation4], 256  }
  0xaf   :  { %220 = vsyncadd [#allocation4], 4294967040 }
  0xb0   :  { %129 = vsyncpa [#allocation3], 1 }
  0xb1   :  { %130 = vsyncpa [#allocation6], 1 }
  0xb2   :  { %131 = vsyncpa [#allocation4], 1 }

</bundles_post_ra>
